<compile_context>
chip_gen: v5e
topology: v5e:2x2
jax: 0.10.0
libtpu: 0.0.40
codegen_flags: <defaults>
</compile_context>

<pallas_src>
import jax
import jax.numpy as jnp
from jax.experimental import pallas as pl
from jax.experimental.pallas import tpu as pltpu


# ---------------------------------------------------------------------------
# Fused kernel: batched single-inequality QP solve + view(10,-1) + log_softmax.
# ---------------------------------------------------------------------------
def _optnet_fused_kernel(p_ref, w_ref, s_ref, o_ref):
    C = p_ref.shape[1]

    p = p_ref[...]                     # (B, C)   linear terms, one QP per row
    qw = w_ref[:C, :]                  # (C, C+1) = [-Qinv | -Qinv G^T]
    drow = w_ref[C:C + 1, :C]          # (1, C)   = G Qinv
    h = s_ref[0]                       # SMEM scalar
    inv_gqg = s_ref[1]                 # SMEM scalar: 1 / (G Qinv G^T)

    # One MXU matmul yields both the unconstrained minimizer and G z_unc.
    y = jnp.dot(p, qw, preferred_element_type=jnp.float32)   # (B, C+1)
    z_unc = y[:, :C]                   # (B, C)  = -p Qinv
    gz = y[:, C:]                      # (B, 1)  = G z_unc

    # Clamped dual (guarded: zero when the constraint is inactive; no divide).
    slack = gz - h                                            # (B, 1)
    lam = jnp.where(slack > 0.0, slack * inv_gqg, 0.0)        # (B, 1)
    z = z_unc - lam * drow                                    # (B, C)

    # x.view(10, -1) is the identity here (B == 10); fused row-wise log_softmax.
    mx = jnp.max(z, axis=-1, keepdims=True)
    s = z - mx
    lse = jnp.log(jnp.sum(jnp.exp(s), axis=-1, keepdims=True))
    o_ref[...] = s - lse


def optnet_forward(x, Q, p, G, h, m):
    """JAX/Pallas equivalent of OptNet.forward (qpth QPFunction + log_softmax)."""
    nBatch = x.shape[0]  # noqa: F841  (PyTorch reads it but never uses it)

    if m > 1:
        p = p.T.astype(jnp.float32)
    else:
        p = p.astype(jnp.float32)
    G = G.astype(jnp.float32)
    Q = Q.astype(jnp.float32)
    h = h.astype(jnp.float32)
    # (m >= 2 unsqueeze of Q is a no-op for the shared-Q solve below.)

    B, C = p.shape
    assert G.shape[0] == 1, "closed-form path implemented for nineq == 1"
    # forward hard-codes x.view(10, -1); with B == 10 the view is an identity,
    # which lets the log_softmax fuse into the same kernel.
    assert B == 10 and (B * C) % 10 == 0

    # Glue (parameter-setup-scale work): Cholesky solves with the tiny shared
    # PD matrix Q, producing Q^{-1}, G Q^{-1} and G Q^{-1} G^T once.
    # TODO(synk): no clean small-dim Pallas form for an 8x8 Cholesky; kept in JAX.
    cf = jax.scipy.linalg.cho_factor(Q)
    qinv = jax.scipy.linalg.cho_solve(cf, jnp.eye(C, dtype=jnp.float32))  # (C, C)
    dcol = jax.scipy.linalg.cho_solve(cf, G.T)                            # (C, 1) = Qinv G^T
    gqg = (G @ dcol)[0, 0]                                                # scalar
    inv_gqg = jnp.where(gqg > 0.0, 1.0 / gqg, 0.0)

    # Pack all batch-independent matrices into one VMEM tile (signs pre-folded):
    #   W = [[-Qinv,    -Qinv G^T],
    #        [ G Qinv,   0       ]]
    W = jnp.zeros((C + 1, C + 1), jnp.float32)
    W = W.at[:C, :C].set(-qinv)
    W = W.at[:C, C].set(-dcol[:, 0])
    W = W.at[C, :C].set(dcol[:, 0])        # G Qinv == (Qinv G^T)^T (Qinv symmetric)

    scalars = jnp.stack([h[0], inv_gqg])   # (2,) SMEM scalars

    vmem = pl.BlockSpec(memory_space=pltpu.MemorySpace.VMEM)
    smem = pl.BlockSpec(memory_space=pltpu.MemorySpace.SMEM)

    # Gridless single-shot call: whole arrays, no pipeline / grid-loop overhead.
    out = pl.pallas_call(
        _optnet_fused_kernel,
        out_shape=jax.ShapeDtypeStruct((B, C), jnp.float32),
        in_specs=[vmem, vmem, smem],
        out_specs=vmem,
    )(p, W, scalars)
    return out


# ---------------------------------------------------------------------------
# Pure-JAX reference (same closed form) for a correctness check.
# ---------------------------------------------------------------------------
def _reference_forward(Q, p, G, h):
    Qinv = jnp.linalg.inv(Q)
    z_unc = -p @ Qinv
    d = G @ Qinv                                   # (1, C)
    gqg = (d @ G.T)[0, 0]
    slack = z_unc @ G.T - h                        # (B, 1)
    lam = jnp.where(slack > 0.0, slack / gqg, 0.0)
    z = z_unc - lam * d
    y = z.reshape(10, -1)
    return jax.nn.log_softmax(y, axis=1)


def init_optnet_params(key, nFeatures, nHidden, nCls, nineq=1):
    """Deterministic init of the module's parameters (shapes from __init__).
    Created exactly as the PyTorch module does, but — just like in the PyTorch
    forward() — they are NOT used in the forward computation."""
    ks = jax.random.split(key, 6)
    params = {
        "fc1_w": jax.random.normal(ks[0], (nHidden, nFeatures), jnp.float32) * 0.1,
        "fc1_b": jnp.zeros((nHidden,), jnp.float32),
        "fc2_w": jax.random.normal(ks[1], (nCls, nHidden), jnp.float32) * 0.1,
        "fc2_b": jnp.zeros((nCls,), jnp.float32),
        "M": jnp.tril(jnp.ones((nCls, nCls), jnp.float32)),
        "L": jnp.tril(jax.random.uniform(ks[2], (nCls, nCls), jnp.float32)),
        "p": jax.random.uniform(ks[3], (1, nCls), jnp.float32, -1.0, 1.0),
        "G": jax.random.uniform(ks[4], (nineq, nCls), jnp.float32, -1.0, 1.0),
        "z0": jnp.zeros((nCls,), jnp.float32),
        "s0": jnp.ones((nineq,), jnp.float32),
        "bn1_gamma": jnp.ones((nHidden,), jnp.float32),
        "bn1_beta": jnp.zeros((nHidden,), jnp.float32),
        "bn2_gamma": jnp.ones((nCls,), jnp.float32),
        "bn2_beta": jnp.zeros((nCls,), jnp.float32),
    }
    return params


if __name__ == "__main__":
    nFeatures, nHidden, nCls, nineq = 16, 32, 8, 1
    nBatch = 10  # forward hard-codes x.view(10, -1)

    key = jax.random.PRNGKey(0)
    k_x, k_q, k_p, k_g, k_h, k_params = jax.random.split(key, 6)

    # Module parameters (deterministic; unused in forward, as in PyTorch).
    _ = init_optnet_params(k_params, nFeatures, nHidden, nCls, nineq)

    # Forward inputs.
    x = jax.random.normal(k_x, (nBatch, nFeatures), jnp.float32)
    A = jax.random.normal(k_q, (nCls, nCls), jnp.float32)
    Q = A @ A.T + 1e-1 * jnp.eye(nCls, dtype=jnp.float32)      # PD
    p = jax.random.normal(k_p, (nBatch, nCls), jnp.float32)
    G = jax.random.uniform(k_g, (nineq, nCls), jnp.float32, -1.0, 1.0)
    h = jax.random.uniform(k_h, (nineq,), jnp.float32, 0.0, 1.0)
    m = 1

    fwd = jax.jit(optnet_forward, static_argnames=("m",))
    out = jax.block_until_ready(fwd(x, Q, p, G, h, m=m))
    ref = jax.block_until_ready(_reference_forward(Q, p, G, h))

    assert out.shape == (10, (nBatch * nCls) // 10)
    assert bool(jnp.all(jnp.isfinite(out)))
    assert bool(jnp.allclose(out, ref, atol=1e-4, rtol=1e-4)), (
        f"max abs err {float(jnp.max(jnp.abs(out - ref)))}"
    )
    print("KERNEL_OK")
</pallas_src>

<mosaic_0001>
module attributes {stable_mosaic.version = 11 : i64} {
  func.func @_optnet_fused_kernel(%arg0: memref<10x8xf32, #tpu.memory_space<vmem>>, %arg1: memref<9x9xf32, #tpu.memory_space<vmem>>, %arg2: memref<2xf32, #tpu.memory_space<smem>>, %arg3: memref<10x8xf32, #tpu.memory_space<vmem>>) attributes {dimension_semantics = [], scalar_prefetch = 0 : i64, scratch_operands = 0 : i64, tpu.core_type = #tpu.core_type<tc>} {
    %c0 = arith.constant 0 : index
    %c0_0 = arith.constant 0 : index
    %0 = vector.load %arg0[%c0, %c0_0] : memref<10x8xf32, #tpu.memory_space<vmem>>, vector<10x8xf32>
    %c0_1 = arith.constant 0 : index
    %c0_2 = arith.constant 0 : index
    %1 = vector.load %arg1[%c0_1, %c0_2] : memref<9x9xf32, #tpu.memory_space<vmem>>, vector<8x9xf32>
    %c8 = arith.constant 8 : index
    %c0_3 = arith.constant 0 : index
    %2 = vector.load %arg1[%c8, %c0_3] : memref<9x9xf32, #tpu.memory_space<vmem>>, vector<1x8xf32>
    %c0_4 = arith.constant 0 : index
    %3 = memref.load %arg2[%c0_4] : memref<2xf32, #tpu.memory_space<smem>>
    %c1 = arith.constant 1 : index
    %4 = memref.load %arg2[%c1] : memref<2xf32, #tpu.memory_space<smem>>
    %cst = arith.constant dense<0.000000e+00> : vector<10x9xf32>
    %5 = tpu.matmul %0, %1, %cst {dimension_numbers = #tpu.dot_dimension_numbers<[1], [0], [0], [1], [0, 0, 1, 1], [], []>} : vector<10x8xf32>, vector<8x9xf32>, vector<10x9xf32> -> vector<10x9xf32>
    %6 = vector.extract_strided_slice %5 {offsets = [0, 0], sizes = [10, 8], strides = [1, 1]} : vector<10x9xf32> to vector<10x8xf32>
    %7 = vector.extract_strided_slice %5 {offsets = [0, 8], sizes = [10, 1], strides = [1, 1]} : vector<10x9xf32> to vector<10x1xf32>
    %8 = vector.broadcast %3 : f32 to vector<10x1xf32>
    %9 = arith.subf %7, %8 : vector<10x1xf32>
    %cst_5 = arith.constant 0.000000e+00 : f32
    %10 = vector.broadcast %cst_5 : f32 to vector<10x1xf32>
    %11 = arith.cmpf ogt, %9, %10 : vector<10x1xf32>
    %12 = vector.broadcast %4 : f32 to vector<10x1xf32>
    %13 = arith.mulf %9, %12 : vector<10x1xf32>
    %cst_6 = arith.constant 0.000000e+00 : f32
    %14 = vector.broadcast %cst_6 : f32 to vector<10x1xf32>
    %15 = arith.select %11, %13, %14 : vector<10x1xi1>, vector<10x1xf32>
    %16 = vector.broadcast %15 : vector<10x1xf32> to vector<10x8xf32>
    %17 = vector.broadcast %2 : vector<1x8xf32> to vector<10x8xf32>
    %18 = arith.mulf %16, %17 : vector<10x8xf32>
    %19 = arith.subf %6, %18 : vector<10x8xf32>
    %cst_7 = arith.constant dense<0xFF800000> : vector<10xf32>
    %20 = vector.multi_reduction <maximumf>, %19, %cst_7 [1] : vector<10x8xf32> to vector<10xf32>
    %21 = vector.shape_cast %20 : vector<10xf32> to vector<10x1xf32>
    %22 = vector.broadcast %21 : vector<10x1xf32> to vector<10x8xf32>
    %23 = arith.subf %19, %22 : vector<10x8xf32>
    %24 = math.exp %23 : vector<10x8xf32>
    %cst_8 = arith.constant dense<0.000000e+00> : vector<10xf32>
    %25 = vector.multi_reduction <add>, %24, %cst_8 [1] : vector<10x8xf32> to vector<10xf32>
    %26 = vector.shape_cast %25 : vector<10xf32> to vector<10x1xf32>
    %27 = math.log %26 : vector<10x1xf32>
    %28 = vector.broadcast %27 : vector<10x1xf32> to vector<10x8xf32>
    %29 = arith.subf %23, %28 : vector<10x8xf32>
    %c0_9 = arith.constant 0 : index
    %c0_10 = arith.constant 0 : index
    %30 = vector.load %arg3[%c0_9, %c0_10] : memref<10x8xf32, #tpu.memory_space<vmem>>, vector<10x8xf32>
    tpu.vector_store %arg3[%c0_9, %c0_10], %29 {strides = array<i32>} : memref<10x8xf32, #tpu.memory_space<vmem>>, vector<10x8xf32>,
    return
  }
}

</mosaic_0001>

<bundles_post_ra>
// kernel: custom-call.10
= control target key start
LH: loop header
LB: loop body
LE: loop exit
PB: predicated region body
PF: predicated region fallthrough
CT: control target
= control target key end

     0   :  { %v338_v0 = vmov 0.0   ;;  %vm36_vm3 = vcmask 7168   ;;  %vm63_vm5 = vcmask 15368   ;;  %vm89_vm6 = vcmask 1047553   ;;  %s366_s0 = inlined_call_operand.vmem [shape: f32[8,8], index: 0, kind: input, shape index: {}]   ;;  %s367_s1 = inlined_call_operand.vmem [shape: f32[8,8], index: 1, kind: output, shape index: {}]  }
   0x1   :  { %35 = vst [vmem:[#allocation1] sm:$0xff] %v338_v0  ;;  %v352_v4 = vld [vmem:[%s366_s0] sm:$0xff]  ;;  %vm90_vm9 = vmand %vm63_vm5, %vm89_vm6  ;;  %vm94_vm11 = vcmask 23568   ;;  %vm120_vm12 = vcmask 1047554  }
   0x2   :  { %31 = vst [vmem:[#allocation0] sm:$0xff] %v352_v4  ;;  %vm121_vm15 = vmand %vm94_vm11, %vm120_vm12 }
   0x8   :  { %v37_v1 = vld [vmem:[#allocation1] ss:$0 sm:$0xff] }
   0x9   :  { %v39_v2 = vmul.f32 %v37_v1, %v37_v1  ;;  %v55_v3 = vmul.f32 0.0, %v37_v1  ;;  %v38_v5 = vld [vmem:[#allocation0] ss:$0 sm:$0xff]  ;;  %v67_v22 = vld [vmem:[#allocation0 + $0x1] ss:$0 sm:$0xff] }
   0xa   :  { %v98_v40 = vld [vmem:[#allocation0 + $0x2] ss:$0 sm:$0xff]  ;;  %v129_v58 = vld [vmem:[#allocation0 + $0x3] ss:$0 sm:$0xff] }
   0xb   :  { %40 = vadd.xlane.f32.xlu0 %v39_v2 }
  0x13   :  { %56 = vadd.xlane.f32.xlu0 %v55_v3 }
  0x7e   :  { %v41_v6 = vpop.xlane.xlu0 %40 }
  0x7f   :  { %v42_v7 = vsub.f32 %v38_v5, %v41_v6 }
  0x81   :  { %322 = vrsqrt.f32 %v42_v7  ;;  %vm49_vm1 = vweird.f32 %v42_v7 }
  0x86   :  { %v57_v12 = vpop.xlane.xlu0 %56 }
  0x87   :  { %v323_v8 = vpop.eup %322  ;;  %v58_v14 = vsub.f32 %v352_v4, %v57_v12 }
  0x88   :  { %v44_v9 = vmul.f32 %v323_v8, %v42_v7  ;;  %vm50_vm0 = vweird.f32 %v323_v8 }
  0x89   :  { %vm51_vm2 = vmor %vm49_vm1, %vm50_vm0  ;;  %vm125_vm1 = vcmask 31768  }
  0x8a   :  { %v45_v10 = vmul.f32 %v323_v8, %v44_v9 }
  0x8c   :  { %v46_v11 = vmul.f32 0.5, %v45_v10 }
  0x8e   :  { %v47_v13 = vsub.f32 1.5, %v46_v11 }
  0x90   :  { %v48_v15 = vmul.f32 %v323_v8, %v47_v13  ;;  %v160_v13 = vld [vmem:[#allocation0 + $0x4] ss:$0 sm:$0xff] }
  0x92   :  { %v52_v16 = vsel %vm51_vm2, %v323_v8, %v48_v15  ;;  %vm151_vm2 = vcmask 1047555  }
  0x93   :  { %v59_v17 = vmul.f32 %v58_v14, %v52_v16  ;;  %vm152_vm5 = vmand %vm125_vm1, %vm151_vm2 }
  0x95   :  { %v60_v18 = vsel %vm36_vm3, %v59_v17, 0.0 }
  0x96   :  { %62 = vst [vmem:[#allocation1] sm:$0xff] %v60_v18 }
  0x9d   :  { %v65_v19 = vld [vmem:[#allocation1 + $0x1] ss:$0 sm:$0xff] }
  0x9e   :  { %v68_v20 = vmul.f32 %v65_v19, %v65_v19  ;;  %v84_v21 = vmul.f32 %v65_v19, %v60_v18 }
  0xa0   :  { %69 = vadd.xlane.f32.xlu1 %v68_v20 }
  0xa8   :  { %85 = vadd.xlane.f32.xlu1 %v84_v21 }
 0x113   :  { %v70_v23 = vpop.xlane.xlu1 %69 }
 0x114   :  { %v71_v24 = vsub.f32 %v67_v22, %v70_v23 }
 0x116   :  { %324 = vrsqrt.f32 %v71_v24  ;;  %vm78_vm7 = vweird.f32 %v71_v24 }
 0x11b   :  { %v86_v30 = vpop.xlane.xlu1 %85 }
 0x11c   :  { %v325_v25 = vpop.eup %324  ;;  %v87_v32 = vsub.f32 %v352_v4, %v86_v30 }
 0x11d   :  { %v73_v26 = vmul.f32 %v325_v25, %v71_v24  ;;  %vm79_vm4 = vweird.f32 %v325_v25 }
 0x11e   :  { %vm80_vm8 = vmor %vm78_vm7, %vm79_vm4  ;;  %vm156_vm7 = vcmask 39968  }
 0x11f   :  { %v74_v27 = vmul.f32 %v325_v25, %v73_v26 }
 0x121   :  { %v75_v28 = vmul.f32 0.5, %v74_v27 }
 0x123   :  { %v76_v29 = vsub.f32 1.5, %v75_v28 }
 0x125   :  { %v77_v31 = vmul.f32 %v325_v25, %v76_v29 }
 0x127   :  { %v81_v33 = vsel %vm80_vm8, %v325_v25, %v77_v31  ;;  %vm182_vm8 = vcmask 1047556   ;;  %v191_v31 = vld [vmem:[#allocation0 + $0x5] ss:$0 sm:$0xff] }
 0x128   :  { %v88_v34 = vmul.f32 %v87_v32, %v81_v33  ;;  %vm183_vm11 = vmand %vm156_vm7, %vm182_vm8 }
 0x12a   :  { %v91_v35 = vsel %vm90_vm9, %v88_v34, 0.0 }
 0x12b   :  { %v92_v36 = vadd.f32 %v91_v35, %v60_v18 }
 0x12d   :  { %93 = vst [vmem:[#allocation1] sm:$0xff] %v92_v36 }
 0x134   :  { %v96_v37 = vld [vmem:[#allocation1 + $0x2] ss:$0 sm:$0xff] }
 0x135   :  { %v99_v38 = vmul.f32 %v96_v37, %v96_v37  ;;  %v115_v39 = vmul.f32 %v96_v37, %v92_v36 }
 0x137   :  { %100 = vadd.xlane.f32.xlu2 %v99_v38 }
 0x13f   :  { %116 = vadd.xlane.f32.xlu2 %v115_v39 }
 0x1aa   :  { %v101_v41 = vpop.xlane.xlu2 %100 }
 0x1ab   :  { %v102_v42 = vsub.f32 %v98_v40, %v101_v41 }
 0x1ad   :  { %326 = vrsqrt.f32 %v102_v42  ;;  %vm109_vm13 = vweird.f32 %v102_v42 }
 0x1b2   :  { %v117_v48 = vpop.xlane.xlu2 %116 }
 0x1b3   :  { %v327_v43 = vpop.eup %326  ;;  %v118_v50 = vsub.f32 %v352_v4, %v117_v48 }
 0x1b4   :  { %v104_v44 = vmul.f32 %v327_v43, %v102_v42  ;;  %vm110_vm10 = vweird.f32 %v327_v43 }
 0x1b5   :  { %vm111_vm14 = vmor %vm109_vm13, %vm110_vm10  ;;  %vm187_vm13 = vcmask 48168  }
 0x1b6   :  { %v105_v45 = vmul.f32 %v327_v43, %v104_v44 }
 0x1b8   :  { %v106_v46 = vmul.f32 0.5, %v105_v45 }
 0x1ba   :  { %v107_v47 = vsub.f32 1.5, %v106_v46 }
 0x1bc   :  { %v108_v49 = vmul.f32 %v327_v43, %v107_v47 }
 0x1be   :  { %v112_v51 = vsel %vm111_vm14, %v327_v43, %v108_v49  ;;  %vm213_vm14 = vcmask 1047557   ;;  %v222_v49 = vld [vmem:[#allocation0 + $0x6] ss:$0 sm:$0xff] }
 0x1bf   :  { %v119_v52 = vmul.f32 %v118_v50, %v112_v51  ;;  %vm214_vm1 = vmand %vm187_vm13, %vm213_vm14 }
 0x1c1   :  { %v122_v53 = vsel %vm121_vm15, %v119_v52, 0.0 }
 0x1c2   :  { %v123_v54 = vadd.f32 %v122_v53, %v92_v36 }
 0x1c4   :  { %124 = vst [vmem:[#allocation1] sm:$0xff] %v123_v54 }
 0x1cb   :  { %v127_v55 = vld [vmem:[#allocation1 + $0x3] ss:$0 sm:$0xff] }
 0x1cc   :  { %v146_v56 = vmul.f32 %v127_v55, %v123_v54  ;;  %v130_v57 = vmul.f32 %v127_v55, %v127_v55 }
 0x1ce   :  { %147 = vadd.xlane.f32.xlu1 %v146_v56  ;;  %131 = vadd.xlane.f32.xlu0 %v130_v57 }
 0x241   :  { %v132_v59 = vpop.xlane.xlu0 %131  ;;  %v148_v1 = vpop.xlane.xlu1 %147 }
 0x242   :  { %v133_v60 = vsub.f32 %v129_v58, %v132_v59  ;;  %v149_v5 = vsub.f32 %v352_v4, %v148_v1 }
 0x244   :  { %328 = vrsqrt.f32 %v133_v60  ;;  %vm140_vm3 = vweird.f32 %v133_v60 }
 0x24a   :  { %v329_v61 = vpop.eup %328 }
 0x24b   :  { %v135_v62 = vmul.f32 %v329_v61, %v133_v60  ;;  %vm141_vm0 = vweird.f32 %v329_v61 }
 0x24c   :  { %vm142_vm4 = vmor %vm140_vm3, %vm141_vm0  ;;  %vm218_vm3 = vcmask 56368  }
 0x24d   :  { %v136_v63 = vmul.f32 %v329_v61, %v135_v62 }
 0x24f   :  { %v137_v0 = vmul.f32 0.5, %v136_v63 }
 0x251   :  { %v138_v2 = vsub.f32 1.5, %v137_v0 }
 0x253   :  { %v139_v3 = vmul.f32 %v329_v61, %v138_v2 }
 0x255   :  { %v143_v6 = vsel %vm142_vm4, %v329_v61, %v139_v3  ;;  %vm244_vm4 = vcmask 1047558   ;;  %v253_v3 = vld [vmem:[#allocation0 + $0x7] ss:$0 sm:$0xff] }
 0x256   :  { %v150_v7 = vmul.f32 %v149_v5, %v143_v6  ;;  %vm245_vm7 = vmand %vm218_vm3, %vm244_vm4 }
 0x258   :  { %v153_v8 = vsel %vm152_vm5, %v150_v7, 0.0 }
 0x259   :  { %v154_v9 = vadd.f32 %v153_v8, %v123_v54 }
 0x25b   :  { %155 = vst [vmem:[#allocation1] sm:$0xff] %v154_v9 }
 0x262   :  { %v158_v10 = vld [vmem:[#allocation1 + $0x4] ss:$0 sm:$0xff] }
 0x263   :  { %v177_v11 = vmul.f32 %v158_v10, %v154_v9  ;;  %v161_v12 = vmul.f32 %v158_v10, %v158_v10 }
 0x265   :  { %178 = vadd.xlane.f32.xlu0 %v177_v11  ;;  %162 = vadd.xlane.f32.xlu2 %v161_v12 }
 0x2d8   :  { %v163_v14 = vpop.xlane.xlu2 %162  ;;  %v179_v20 = vpop.xlane.xlu0 %178 }
 0x2d9   :  { %v164_v15 = vsub.f32 %v160_v13, %v163_v14  ;;  %v180_v23 = vsub.f32 %v352_v4, %v179_v20 }
 0x2db   :  { %330 = vrsqrt.f32 %v164_v15  ;;  %vm171_vm9 = vweird.f32 %v164_v15 }
 0x2e1   :  { %v331_v16 = vpop.eup %330 }
 0x2e2   :  { %v166_v17 = vmul.f32 %v331_v16, %v164_v15  ;;  %vm172_vm6 = vweird.f32 %v331_v16 }
 0x2e3   :  { %vm173_vm10 = vmor %vm171_vm9, %vm172_vm6  ;;  %vm249_vm9 = vcmask 64568  }
 0x2e4   :  { %v167_v18 = vmul.f32 %v331_v16, %v166_v17 }
 0x2e6   :  { %v168_v19 = vmul.f32 0.5, %v167_v18 }
 0x2e8   :  { %v169_v21 = vsub.f32 1.5, %v168_v19 }
 0x2ea   :  { %v170_v22 = vmul.f32 %v331_v16, %v169_v21 }
 0x2ec   :  { %v174_v24 = vsel %vm173_vm10, %v331_v16, %v170_v22  ;;  %vm275_vm10 = vcmask 1047559  }
 0x2ed   :  { %v181_v25 = vmul.f32 %v180_v23, %v174_v24  ;;  %vm276_vm13 = vmand %vm249_vm9, %vm275_vm10 }
 0x2ef   :  { %v184_v26 = vsel %vm183_vm11, %v181_v25, 0.0 }
 0x2f0   :  { %v185_v27 = vadd.f32 %v184_v26, %v154_v9 }
 0x2f2   :  { %186 = vst [vmem:[#allocation1] sm:$0xff] %v185_v27 }
 0x2f9   :  { %v189_v28 = vld [vmem:[#allocation1 + $0x5] ss:$0 sm:$0xff] }
 0x2fa   :  { %v208_v29 = vmul.f32 %v189_v28, %v185_v27  ;;  %v192_v30 = vmul.f32 %v189_v28, %v189_v28 }
 0x2fc   :  { %209 = vadd.xlane.f32.xlu2 %v208_v29  ;;  %193 = vadd.xlane.f32.xlu1 %v192_v30 }
 0x36f   :  { %v194_v32 = vpop.xlane.xlu1 %193  ;;  %v210_v38 = vpop.xlane.xlu2 %209 }
 0x370   :  { %v195_v33 = vsub.f32 %v191_v31, %v194_v32  ;;  %v211_v41 = vsub.f32 %v352_v4, %v210_v38 }
 0x372   :  { %332 = vrsqrt.f32 %v195_v33  ;;  %vm202_vm15 = vweird.f32 %v195_v33 }
 0x378   :  { %v333_v34 = vpop.eup %332 }
 0x379   :  { %v197_v35 = vmul.f32 %v333_v34, %v195_v33  ;;  %vm203_vm12 = vweird.f32 %v333_v34 }
 0x37a   :  { %vm204_vm0 = vmor %vm202_vm15, %vm203_vm12 }
 0x37b   :  { %v198_v36 = vmul.f32 %v333_v34, %v197_v35 }
 0x37d   :  { %v199_v37 = vmul.f32 0.5, %v198_v36 }
 0x37f   :  { %v200_v39 = vsub.f32 1.5, %v199_v37 }
 0x381   :  { %v201_v40 = vmul.f32 %v333_v34, %v200_v39 }
 0x383   :  { %v205_v42 = vsel %vm204_vm0, %v333_v34, %v201_v40 }
 0x384   :  { %v212_v43 = vmul.f32 %v211_v41, %v205_v42 }
 0x386   :  { %v215_v44 = vsel %vm214_vm1, %v212_v43, 0.0 }
 0x387   :  { %v216_v45 = vadd.f32 %v215_v44, %v185_v27 }
 0x389   :  { %217 = vst [vmem:[#allocation1] sm:$0xff] %v216_v45 }
 0x390   :  { %v220_v46 = vld [vmem:[#allocation1 + $0x6] ss:$0 sm:$0xff] }
 0x391   :  { %v239_v47 = vmul.f32 %v220_v46, %v216_v45  ;;  %v223_v48 = vmul.f32 %v220_v46, %v220_v46 }
 0x393   :  { %240 = vadd.xlane.f32.xlu1 %v239_v47  ;;  %224 = vadd.xlane.f32.xlu0 %v223_v48 }
 0x406   :  { %v225_v50 = vpop.xlane.xlu0 %224  ;;  %v241_v56 = vpop.xlane.xlu1 %240 }
 0x407   :  { %v226_v51 = vsub.f32 %v222_v49, %v225_v50  ;;  %v242_v59 = vsub.f32 %v352_v4, %v241_v56 }
 0x409   :  { %334 = vrsqrt.f32 %v226_v51  ;;  %vm233_vm5 = vweird.f32 %v226_v51 }
 0x40f   :  { %v335_v52 = vpop.eup %334 }
 0x410   :  { %v228_v53 = vmul.f32 %v335_v52, %v226_v51  ;;  %vm234_vm2 = vweird.f32 %v335_v52 }
 0x411   :  { %vm235_vm6 = vmor %vm233_vm5, %vm234_vm2 }
 0x412   :  { %v229_v54 = vmul.f32 %v335_v52, %v228_v53 }
 0x414   :  { %v230_v55 = vmul.f32 0.5, %v229_v54 }
 0x416   :  { %v231_v57 = vsub.f32 1.5, %v230_v55 }
 0x418   :  { %v232_v58 = vmul.f32 %v335_v52, %v231_v57 }
 0x41a   :  { %v236_v60 = vsel %vm235_vm6, %v335_v52, %v232_v58 }
 0x41b   :  { %v243_v61 = vmul.f32 %v242_v59, %v236_v60 }
 0x41d   :  { %v246_v62 = vsel %vm245_vm7, %v243_v61, 0.0 }
 0x41e   :  { %v247_v63 = vadd.f32 %v246_v62, %v216_v45 }
 0x420   :  { %248 = vst [vmem:[#allocation1] sm:$0xff] %v247_v63 }
 0x427   :  { %v251_v0 = vld [vmem:[#allocation1 + $0x7] ss:$0 sm:$0xff] }
 0x428   :  { %v270_v1 = vmul.f32 %v251_v0, %v247_v63  ;;  %v254_v2 = vmul.f32 %v251_v0, %v251_v0 }
 0x42a   :  { %271 = vadd.xlane.f32.xlu0 %v270_v1  ;;  %255 = vadd.xlane.f32.xlu2 %v254_v2 }
 0x49d   :  { %v256_v5 = vpop.xlane.xlu2 %255  ;;  %v272_v11 = vpop.xlane.xlu0 %271 }
 0x49e   :  { %v257_v6 = vsub.f32 %v253_v3, %v256_v5  ;;  %v273_v14 = vsub.f32 %v352_v4, %v272_v11 }
 0x4a0   :  { %336 = vrsqrt.f32 %v257_v6  ;;  %vm264_vm11 = vweird.f32 %v257_v6 }
 0x4a6   :  { %v337_v7 = vpop.eup %336 }
 0x4a7   :  { %v259_v8 = vmul.f32 %v337_v7, %v257_v6  ;;  %vm265_vm8 = vweird.f32 %v337_v7 }
 0x4a8   :  { %vm266_vm12 = vmor %vm264_vm11, %vm265_vm8 }
 0x4a9   :  { %v260_v9 = vmul.f32 %v337_v7, %v259_v8 }
 0x4ab   :  { %v261_v10 = vmul.f32 0.5, %v260_v9 }
 0x4ad   :  { %v262_v12 = vsub.f32 1.5, %v261_v10 }
 0x4af   :  { %v263_v13 = vmul.f32 %v337_v7, %v262_v12 }
 0x4b1   :  { %v267_v15 = vsel %vm266_vm12, %v337_v7, %v263_v13 }
 0x4b2   :  { %v274_v16 = vmul.f32 %v273_v14, %v267_v15 }
 0x4b4   :  { %v277_v17 = vsel %vm276_vm13, %v274_v16, 0.0 }
 0x4b5   :  { %v278_v18 = vadd.f32 %v277_v17, %v247_v63 }
 0x4b7   :  { %279 = vst [vmem:[#allocation1] sm:$0xff] %v278_v18 }
 0x4b8   :  { %309 = vst [vmem:[%s367_s1] sm:$0xff] %v278_v18 }

// kernel: custom-call.11
= control target key start
LH: loop header
LB: loop body
LE: loop exit
PB: predicated region body
PF: predicated region fallthrough
CT: control target
= control target key end

     0   :  { %v35_v0 = vlaneseq  ;;  %v207_v18 = vmov -1.0   ;;  %s249_s0 = inlined_call_operand.vmem [shape: f32[1,8,8], index: 0, kind: input, shape index: {}]   ;;  %s250_s1 = inlined_call_operand.vmem [shape: f32[1,8,8], index: 1, kind: output, shape index: {}]  }
   0x1   :  { %v30_v1 = vld [vmem:[%s249_s0] sm:$0xff] }
   0x2   :  { %v221_v2 = vand.u32 127, %v35_v0  ;;  %v39_v3 = vshrl.u32 %v35_v0, 7 }
   0x4   :  { %vm41_vm0 = vcmp.eq.s32.totalorder %v39_v3, %v221_v2  ;;  %vm37_vm1 = vcmp.lt.s32.totalorder %v221_v2, 8  ;;  %vm46_vm2 = vcmp.le.s32.totalorder %v39_v3, %v221_v2  ;;  %vm73_vm8 = vcmp.eq.s32.totalorder %v221_v2, 7 }
   0x5   :  { %v43_v4 = vsel %vm41_vm0, %v30_v1, 0.0  ;;  %vm47_vm3 = vmand %vm46_vm2, %vm37_vm1  ;;  %vm70_vm9 = vcmp.eq.s32.totalorder %v221_v2, %v39_v3  ;;  %v74_v19 = vsel %vm73_vm8, 1.0, %v207_v18  ;;  %vm81_vm10 = vcmp.eq.s32.totalorder %v221_v2, 6 }
   0x6   :  { %44 = vadd.xlane.f32.xlu0 %v43_v4  ;;  %v48_v13 = vsel %vm47_vm3, %v30_v1, 0.0  ;;  %v75_v20 = vsel %vm70_vm9, %v74_v19, 0.0  ;;  %vm91_vm11 = vcmp.eq.s32.totalorder %v221_v2, 5  ;;  %vm101_vm12 = vcmp.eq.s32.totalorder %v221_v2, 4 }
   0x7   :  { %vm111_vm13 = vcmp.eq.s32.totalorder %v221_v2, 3  ;;  %vm121_vm14 = vcmp.eq.s32.totalorder %v221_v2, 2  ;;  %vm131_vm15 = vcmp.eq.s32.totalorder %v221_v2, 1  ;;  %vm140_vm0 = vcmp.eq.s32.totalorder %v221_v2, 0 }
  0x79   :  { %v224_v5 = vpop.xlane.xlu0 %44 }
  0x7a   :  { %205 = vrcp.f32 %v224_v5  ;;  %v60_v9 = vand.u32 2147483648, %v224_v5  ;;  %v58_v11 = vand.u32 2147483647, %v224_v5  ;;  %vm54_vm5 = vweird.f32 %v224_v5 }
  0x7c   :  { %v61_v14 = vor.u32 1.1754944e-38, %v60_v9  ;;  %vm59_vm7 = vcmp.eq.f32.partialorder %v58_v11, 8.507059e+37 }
  0x80   :  { %v206_v6 = vpop.eup %205 }
  0x81   :  { %v50_v7 = vmul.f32 %v206_v6, %v224_v5  ;;  %vm55_vm4 = vweird.f32 %v206_v6 }
  0x82   :  { %vm56_vm6 = vmor %vm54_vm5, %vm55_vm4 }
  0x83   :  { %v51_v8 = vsub.f32 1.0, %v50_v7 }
  0x85   :  { %v52_v10 = vmul.f32 %v206_v6, %v51_v8 }
  0x87   :  { %v53_v12 = vadd.f32 %v206_v6, %v52_v10 }
  0x89   :  { %v57_v15 = vsel %vm56_vm6, %v206_v6, %v53_v12 }
  0x8a   :  { %v62_v16 = vsel %vm59_vm7, %v61_v14, %v57_v15 }
  0x8b   :  { %v63_v17 = vmul.f32 %v62_v16, %v48_v13 }
  0x8d   :  { %64 = vst [vmem:[#allocation2] sm:$0xff] %v63_v17 }
  0x94   :  { %v77_v21 = vld [vmem:[#allocation2 + $0x6] ss:$0 sm:$0xff]  ;;  %v87_v24 = vld [vmem:[#allocation2 + $0x5] ss:$0 sm:$0xff]  ;;  %v97_v29 = vld [vmem:[#allocation2 + $0x4] ss:$0 sm:$0xff] }
  0x95   :  { %v78_v22 = vxor.u32 2147483648, %v77_v21  ;;  %v88_v26 = vxor.u32 2147483648, %v87_v24  ;;  %v98_v31 = vxor.u32 2147483648, %v97_v29  ;;  %v107_v34 = vld [vmem:[#allocation2 + $0x3] ss:$0 sm:$0xff] }
  0x96   :  { %v108_v36 = vxor.u32 2147483648, %v107_v34  ;;  %v117_v39 = vld [vmem:[#allocation2 + $0x2] ss:$0 sm:$0xff]  ;;  %v127_v44 = vld [vmem:[#allocation2 + $0x1] ss:$0 sm:$0xff] }
  0x97   :  { %v82_v23 = vmul.f32 %v78_v22, %v75_v20  ;;  %v118_v41 = vxor.u32 2147483648, %v117_v39  ;;  %v128_v46 = vxor.u32 2147483648, %v127_v44  ;;  %v136_v49 = vld [vmem:[#allocation2] ss:$0 sm:$0xff] }
  0x98   :  { %v137_v51 = vxor.u32 2147483648, %v136_v49 }
  0x99   :  { %83 = vadd.xlane.f32.xlu0 %v82_v23 }
 0x10c   :  { %v84_v25 = vpop.xlane.xlu0 %83 }
 0x10d   :  { %v85_v27 = vsel %vm81_vm10, %v84_v25, %v75_v20 }
 0x10e   :  { %v92_v28 = vmul.f32 %v88_v26, %v85_v27 }
 0x110   :  { %93 = vadd.xlane.f32.xlu1 %v92_v28 }
 0x183   :  { %v94_v30 = vpop.xlane.xlu1 %93 }
 0x184   :  { %v95_v32 = vsel %vm91_vm11, %v94_v30, %v85_v27 }
 0x185   :  { %v102_v33 = vmul.f32 %v98_v31, %v95_v32 }
 0x187   :  { %103 = vadd.xlane.f32.xlu1 %v102_v33 }
 0x1fa   :  { %v104_v35 = vpop.xlane.xlu1 %103 }
 0x1fb   :  { %v105_v37 = vsel %vm101_vm12, %v104_v35, %v95_v32 }
 0x1fc   :  { %v112_v38 = vmul.f32 %v108_v36, %v105_v37 }
 0x1fe   :  { %113 = vadd.xlane.f32.xlu2 %v112_v38 }
 0x271   :  { %v114_v40 = vpop.xlane.xlu2 %113 }
 0x272   :  { %v115_v42 = vsel %vm111_vm13, %v114_v40, %v105_v37 }
 0x273   :  { %v122_v43 = vmul.f32 %v118_v41, %v115_v42 }
 0x275   :  { %123 = vadd.xlane.f32.xlu2 %v122_v43 }
 0x2e8   :  { %v124_v45 = vpop.xlane.xlu2 %123 }
 0x2e9   :  { %v125_v47 = vsel %vm121_vm14, %v124_v45, %v115_v42 }
 0x2ea   :  { %v132_v48 = vmul.f32 %v128_v46, %v125_v47 }
 0x2ec   :  { %133 = vadd.xlane.f32.xlu0 %v132_v48 }
 0x35f   :  { %v134_v50 = vpop.xlane.xlu0 %133 }
 0x360   :  { %v135_v52 = vsel %vm131_vm15, %v134_v50, %v125_v47 }
 0x361   :  { %v141_v53 = vmul.f32 %v137_v51, %v135_v52 }
 0x363   :  { %142 = vadd.xlane.f32.xlu1 %v141_v53 }
 0x3d6   :  { %v143_v54 = vpop.xlane.xlu1 %142 }
 0x3d7   :  { %v144_v55 = vsel %vm140_vm0, %v143_v54, %v135_v52 }
 0x3d8   :  { %v159_v56 = vmul.f32 %v144_v55, %v62_v16 }
 0x3da   :  { %v161_v57 = vsel %vm54_vm5, %v144_v55, %v159_v56 }
 0x3db   :  { %192 = vst [vmem:[%s250_s1] sm:$0xff] %v161_v57 }

// kernel: optnet_forward.1
= control target key start
LH: loop header
LB: loop body
LE: loop exit
PB: predicated region body
PF: predicated region fallthrough
CT: control target
= control target key end

     0   :  { %8 = vsyncpa [#allocation3], 0  ;;  %s150_s15 = smov [#allocation2]   ;;  %s201_s0 = inlined_call_operand.vmem [shape: f32[10,8], index: 0, kind: input, shape index: {}]   ;;  %s202_s1 = inlined_call_operand.vmem [shape: f32[9,9], index: 1, kind: input, shape index: {}]   ;;  %s203_s2 = inlined_call_operand.vmem [shape: f32[2], index: 2, kind: input, shape index: {}]   ;;  %s204_s3 = inlined_call_operand.vmem [shape: f32[10,8], index: 3, kind: output, shape index: {}]  }
   0x1   :  { %s18_s14 = sshll.u32 %s203_s2, 4  ;;  %s19_s14 = int_to_ptr.vmem [resolvable:$true] %s18_s14 }
   0x2   :  { %21 = dma.vmem_to_smem %s19_s14, 16, %s150_s15, [#allocation3]  }
   0x3   :  { %148 = dma.done.wait [#allocation3], 16  }
   0x4   :  { %149 = vsyncadd [#allocation3], 4294967280 }
   0x5   :  { %26 = sfence }
   0x6   :  { %v29_v0 = vld [vmem:[%s202_s1] sm:$0xff]  ;;  %vm33_vm0 = vcmask 64512   ;;  %v28_v2 = vld [vmem:[%s201_s0 + $0x8] sm:$0x3]  ;;  %v151_v3 = vmov 8   ;;  %s31_s2 = sld [smem:[#allocation2]] }
   0x7   :  { %v27_v1 = vld [vmem:[%s201_s0] sm:$0xff]  ;;  %55 = vmatpush.msra.mxu0 %v29_v0  ;;  %123 = vmatpush.msra.mxu1 %v29_v0  ;;  %s120_s22 = sld [smem:[#allocation2 + $0x1]]  ;;  %v127_v14 = vld [vmem:[%s202_s1 + $0x8] ss:$0 sm:$0xff]  ;;  %vm91_vm3 = vcmask 58368  }
   0x8   :  { %121 = vmatmul.msk.f32.vlgmr.msra.gmra.mxu0 %vm33_vm0, %v27_v1  ;;  %122 = vmatmul.msk.f32.vlgmr.msra.gmra.mxu1 %vm33_vm0, %v28_v2 }
   0x9   :  { %126 = vset.pattern.permute.xlu0 %v151_v3 }
   0xc   :  { %v63_v4 = vstv %s31_s2 }
   0xd   :  { %v68_v6 = vstv %s120_s22 }
  0x85   :  { %v57_v5 = vpop.f32.mrf.mxu0  ;;  %v60_v7 = vpop.f32.mrf.mxu1 }
  0x86   :  { %v64_v8 = vsub.f32 %v57_v5, %v63_v4  ;;  %v65_v10 = vsub.f32 %v60_v7, %v63_v4 }
  0x88   :  { %vm66_vm1 = vcmp.gt.f32.partialorder %v64_v8, 0.0  ;;  %v69_v9 = vmul.f32 %v68_v6, %v64_v8  ;;  %v70_v12 = vmul.f32 %v68_v6, %v65_v10  ;;  %vm67_vm2 = vcmp.gt.f32.partialorder %v65_v10, 0.0 }
  0x8a   :  { %v71_v11 = vsel %vm66_vm1, %v69_v9, 0.0  ;;  %v72_v13 = vsel %vm67_vm2, %v70_v12, 0.0 }
  0x8b   :  { %75 = vperm.xlu0 %126, %v71_v11  }
  0x93   :  { %80 = vperm.xlu0 %126, %v72_v13  }
  0xfd   :  { %v76_v15 = vpop.permute.xlu0 %75 }
  0xfe   :  { %v84_v16 = vmul.f32 %v127_v14, %v76_v15 }
 0x100   :  { %v86_v17 = vsub.f32 %v57_v5, %v84_v16 }
 0x102   :  { %v88_v18 = vsel %vm33_vm0, %v86_v17, -inf }
 0x103   :  { %89 = vmax.xlane.f32.xlu1 %v88_v18 }
 0x105   :  { %v81_v19 = vpop.permute.xlu0 %80 }
 0x106   :  { %v85_v20 = vmul.f32 %v127_v14, %v81_v19 }
 0x108   :  { %v87_v21 = vsub.f32 %v60_v7, %v85_v20 }
 0x10a   :  { %v92_v22 = vsel %vm91_vm3, %v87_v21, -inf }
 0x10b   :  { %93 = vmax.xlane.f32.xlu1 %v92_v22 }
 0x176   :  { %v90_v23 = vpop.xlane.xlu1 %89 }
 0x177   :  { %v95_v24 = vsub.f32 %v86_v17, %v90_v23 }
 0x179   :  { %v97_v25 = vmul.f32 1.442695, %v95_v24 }
 0x17b   :  { %128 = vpow2.f32 %v97_v25 }
 0x17e   :  { %v94_v26 = vpop.xlane.xlu1 %93 }
 0x17f   :  { %v96_v27 = vsub.f32 %v87_v21, %v94_v26 }
 0x181   :  { %v129_v28 = vpop.eup %128  ;;  %v99_v29 = vmul.f32 1.442695, %v96_v27 }
 0x182   :  { %v101_v30 = vsel %vm33_vm0, %v129_v28, 0.0 }
 0x183   :  { %130 = vpow2.f32 %v99_v29  ;;  %102 = vadd.xlane.f32.xlu2 %v101_v30 }
 0x189   :  { %v131_v31 = vpop.eup %130 }
 0x18a   :  { %v104_v32 = vsel %vm91_vm3, %v131_v31, 0.0 }
 0x18b   :  { %105 = vadd.xlane.f32.xlu2 %v104_v32 }
 0x1f6   :  { %v103_v33 = vpop.xlane.xlu2 %102 }
 0x1f7   :  { %132 = vlog2.f32 %v103_v33 }
 0x1fd   :  { %v133_v34 = vpop.eup %132 }
 0x1fe   :  { %v108_v35 = vmul.f32 0.6931472, %v133_v34  ;;  %v106_v36 = vpop.xlane.xlu2 %105 }
 0x1ff   :  { %134 = vlog2.f32 %v106_v36 }
 0x200   :  { %v111_v37 = vsub.f32 %v95_v24, %v108_v35 }
 0x202   :  { %113 = vst.msk [vmem:[%s204_s3] sm:$0xff] %vm33_vm0, %v111_v37 }
 0x205   :  { %v135_v38 = vpop.eup %134 }
 0x206   :  { %v110_v39 = vmul.f32 0.6931472, %v135_v38 }
 0x208   :  { %v112_v40 = vsub.f32 %v96_v27, %v110_v39 }
 0x20a   :  { %114 = vst.msk [vmem:[%s204_s3 + $0x8] sm:$0x3] %vm91_vm3, %v112_v40 }
 0x20b   :  { %119 = vsyncpa [#allocation3], 1 }

</bundles_post_ra>
